<compile_context>
chip_gen: v7x
topology: tpu7x:2x2x1
jax: 0.10.0
libtpu: 0.0.40
codegen_flags: <defaults>
</compile_context>

<pallas_src>
import functools
import math

import numpy as np
import jax
import jax.numpy as jnp
from jax.experimental import pallas as pl
from jax.experimental.pallas import tpu as pltpu

# ----------------------------------------------------------------------------
# model config (small shapes, consistent with the module's constructor math)
# ----------------------------------------------------------------------------
B = 2                      # batch
NQ = 4                     # args.num_questions
DG = 32                    # config['d_g_feats']
NUM_FEATURES = 25          # args.num_features  (vocab = 26)
PROT_EMB_DIM = 32          # args.prot_emb_dim
PROT_OUT_DIM = 32          # args.prot_output_dim
N_FILTERS = 8              # args.n_filters
KERNEL_SIZE = 8            # args.kernel_size
IN_CHANNELS = 16           # args.in_channels
MLP_DIM1 = 64              # args.mlp_dim1
MLP_DIM2 = 32              # args.mlp_dim2
NUM_TASK = 1               # args.num_task
INTER_DIM = PROT_EMB_DIM - KERNEL_SIZE + 1        # 25
FC1_XT_DIM = N_FILTERS * INTER_DIM                # 200
GNN_EMB_DIM = 4 * DG                              # clf_emb_dim (trans_encoder_layer == 0)
CLF_IN_DIM = GNN_EMB_DIM + PROT_OUT_DIM           # 160
EMB_FLAT_DIM = IN_CHANNELS * PROT_EMB_DIM         # 512
LN_EPS = 1e-5
M_ROWS = B * NQ                                   # 8 rows = one f32 sublane tile
LANES = 128
# dropout probs (mlp_dropout=0.0, predictor_drop=0.0) -> identity (eval semantics)

# ---- packed-weight slab layout (row offsets; all multiples of 8 -> aligned) ----
_R_PP1 = 0
_R_PP2 = _R_PP1 + NQ * DG            # 128
_R_PL1 = _R_PP2 + DG                 # 160
_R_PROT = _R_PL1 + DG                # 192
_R_FC2 = _R_PROT + EMB_FLAT_DIM      # 704
_R_W32_END = _R_FC2 + MLP_DIM1       # 768

# ---- bias/LN/1-col-weight slab rows ([16, 128]) ----
(_V_B_PP1, _V_B_PP2, _V_B_PL1, _V_W_PL2, _V_B_PL2, _V_B_PROT,
 _V_LNC_G, _V_LNC_B, _V_LNF_G1, _V_LNF_B1, _V_LNF_G2, _V_LNF_B2,
 _V_B_FC1, _V_B_FC2, _V_W_OUT, _V_B_OUT) = range(16)
_N_VROWS = 16


# ----------------------------------------------------------------------------
# in-kernel math helpers
# ----------------------------------------------------------------------------
def _erf(x):
    # Abramowitz & Stegun 7.1.26 erf polynomial (max abs err ~1.5e-7).
    # The divide is routed through the EUP approximate reciprocal (free slot);
    # its ~1e-4-level relative error vanishes under the 0.02-std weights
    # downstream and stays far inside the 1e-3 validation tolerance.
    p = 0.3275911
    a1, a2, a3, a4, a5 = 0.254829592, -0.284496736, 1.421413741, -1.453152027, 1.061405429
    s = jnp.where(x >= 0.0, 1.0, -1.0)
    ax = jnp.abs(x)
    t = pl.reciprocal(1.0 + p * ax, approx=True)
    poly = t * (a1 + t * (a2 + t * (a3 + t * (a4 + t * a5))))
    return s * (1.0 - poly * jnp.exp(-ax * ax))


def _gelu(x):
    return 0.5 * x * (1.0 + _erf(x * (1.0 / math.sqrt(2.0))))


def _layernorm(x, g, b):
    mean = jnp.mean(x, axis=-1, keepdims=True)
    d = x - mean
    var = jnp.mean(d * d, axis=-1, keepdims=True)
    return d * jax.lax.rsqrt(var + LN_EPS) * g + b


# ----------------------------------------------------------------------------
# the single fused kernel (grid-less; everything lives in vregs/VMEM)
# ----------------------------------------------------------------------------
def _fused_forward_kernel(
    prompt_flat_ref,   # [M, NQ*DG]   per-batch prompt, row-duplicated over NQ
    prompt_rows_ref,   # [M, DG]      per-question prompt rows
    mol_repr_ref,      # [M, 3*DG]    per-batch graph repr, row-duplicated
    emb_flat_ref,      # [M, C*E]     flattened protein embedding, row-duplicated
    w32_ref,           # [768, 32]    packed weights with 32 output lanes
    w64_ref,           # [160, 64]    fc1 weight (consumed in three row slices)
    vec_ref,           # [16, 128]    biases / LN params / 1-col weights as rows
    out_ref,           # [M, 128]     lane 0 = pred, lane 1 = interaction
):
    def dot(a, b):
        return jnp.dot(a, b, preferred_element_type=jnp.float32)

    def vrow(r, w):
        return vec_ref[r:r + 1, 0:w]            # static slice -> [1, w]

    # ---- prompt_projection_model: Linear(NQ*DG->DG) -> GELU -> Linear(DG->DG)
    h = _gelu(dot(prompt_flat_ref[...], w32_ref[_R_PP1:_R_PP2, :]) + vrow(_V_B_PP1, DG))
    molecules_prompt = dot(h, w32_ref[_R_PP2:_R_PL1, :]) + vrow(_V_B_PP2, DG)   # [M, DG]

    # ---- prompt_linear_model: Linear(DG->DG) -> GELU -> Linear(DG->1)
    #      (1-col output done on VPU+XLU: broadcast-mul + row reduce, no MXU)
    l1 = _gelu(dot(prompt_rows_ref[...], w32_ref[_R_PL1:_R_PROT, :]) + vrow(_V_B_PL1, DG))
    pred = jnp.sum(l1 * vrow(_V_W_PL2, DG), axis=-1, keepdims=True) + vrow(_V_B_PL2, 1)

    # ---- protein branch: (Conv1d + view + fc1_xt) folded into one matmul,
    #      then conv_norm LayerNorm
    xt = dot(emb_flat_ref[...], w32_ref[_R_PROT:_R_FC2, :]) + vrow(_V_B_PROT, PROT_OUT_DIM)
    xt = _layernorm(xt, vrow(_V_LNC_G, PROT_OUT_DIM), vrow(_V_LNC_B, PROT_OUT_DIM))

    # ---- clf_norm over cat(molecules_prompt, molecule_repr) WITHOUT
    #      materializing the concat: statistics across both pieces.
    rep = mol_repr_ref[...]                                              # [M, 3*DG]
    inv_n = 1.0 / float(GNN_EMB_DIM)
    mean = (jnp.sum(molecules_prompt, axis=-1, keepdims=True)
            + jnp.sum(rep, axis=-1, keepdims=True)) * inv_n
    d1 = molecules_prompt - mean
    d2 = rep - mean
    var = (jnp.sum(d1 * d1, axis=-1, keepdims=True)
           + jnp.sum(d2 * d2, axis=-1, keepdims=True)) * inv_n
    inv = jax.lax.rsqrt(var + LN_EPS)
    hn1 = d1 * inv * vrow(_V_LNF_G1, DG) + vrow(_V_LNF_B1, DG)           # [M, DG]
    hn2 = d2 * inv * vrow(_V_LNF_G2, 3 * DG) + vrow(_V_LNF_B2, 3 * DG)   # [M, 3*DG]

    # ---- head: relu(fc1(cat(h, xt))) -> relu(fc2) -> out
    #      (cat removed by consuming the fc1 weight in three row slices;
    #       dropout p=0 -> identity)
    z = (dot(hn1, w64_ref[0:DG, :])
         + dot(hn2, w64_ref[DG:GNN_EMB_DIM, :])
         + dot(xt, w64_ref[GNN_EMB_DIM:CLF_IN_DIM, :])
         + vrow(_V_B_FC1, MLP_DIM1))
    z = jnp.maximum(z, 0.0)
    z = jnp.maximum(dot(z, w32_ref[_R_FC2:_R_W32_END, :]) + vrow(_V_B_FC2, MLP_DIM2), 0.0)
    # TODO(synk): NUM_TASK == 1 here, so the final Linear(MLP_DIM2 -> NUM_TASK)
    # is a row-reduce; for NUM_TASK > 1 switch this back to an MXU dot.
    inter = jnp.sum(z * vrow(_V_W_OUT, MLP_DIM2), axis=-1, keepdims=True) + vrow(_V_B_OUT, 1)

    # ---- single lane-dense output: [M, 128] full-width unmasked store
    lane = jax.lax.broadcasted_iota(jnp.int32, (M_ROWS, LANES), 1)
    out_ref[...] = jnp.where(lane == 0, pred, jnp.where(lane == 1, inter, 0.0))


_VMEM_SPEC = pl.BlockSpec(memory_space=pltpu.MemorySpace.VMEM)


def _fused_call(prompt_flat, prompt_rows, mol_repr_rows, emb_rows, prep):
    # NOTE: grid-less single call is right at this footprint (<1 MiB VMEM).
    # At real serving batch sizes: add a leading batch grid axis blocked in
    # multiples of 8 rows with dimension_semantics=("parallel",) so both v7x
    # TensorCores get work, give the three weight-slab BlockSpecs constant
    # index_maps (lambda b: (0, 0)) so they stay VMEM-resident across steps,
    # and cast activations/weights to bf16 (keep f32 accumulation) for the
    # v6e/v7x MXU.
    inputs = (prompt_flat, prompt_rows, mol_repr_rows, emb_rows,
              prep["w32"], prep["w64"], prep["vslab"])
    return pl.pallas_call(
        _fused_forward_kernel,
        out_shape=jax.ShapeDtypeStruct((M_ROWS, LANES), jnp.float32),
        in_specs=[_VMEM_SPEC] * len(inputs),
        out_specs=_VMEM_SPEC,
    )(*inputs)


# ----------------------------------------------------------------------------
# parameters: raw (torch-layout) init + one-time preparation (fold / pack)
# ----------------------------------------------------------------------------
def init_raw_params(key):
    ks = jax.random.split(key, 10)
    nrm = lambda k, s: 0.02 * jax.random.normal(k, s, dtype=jnp.float32)
    zeros = lambda s: jnp.zeros(s, jnp.float32)
    ones = lambda s: jnp.ones(s, jnp.float32)
    p = {}
    # prompt_projection_model: Linear(NQ*DG -> DG), GELU, Linear(DG -> DG)
    p["w_pp1"], p["b_pp1"] = nrm(ks[0], (NQ * DG, DG)), zeros((DG,))
    p["w_pp2"], p["b_pp2"] = nrm(ks[1], (DG, DG)), zeros((DG,))
    # prompt_linear_model: Linear(DG -> DG), GELU, Linear(DG -> 1)
    p["w_pl1"], p["b_pl1"] = nrm(ks[2], (DG, DG)), zeros((DG,))
    p["w_pl2"], p["b_pl2"] = nrm(ks[3], (DG, 1)), zeros((1,))
    # ConvMLP.embedding_xt (xavier_uniform)
    bound = math.sqrt(6.0 / (NUM_FEATURES + 1 + PROT_EMB_DIM))
    p["emb_xt"] = jax.random.uniform(ks[4], (NUM_FEATURES + 1, PROT_EMB_DIM),
                                     jnp.float32, -bound, bound)
    # ConvMLP.conv_xt_1: torch Conv1d layout [out_ch=F, in_ch=C, K]
    p["w_conv"], p["b_conv"] = nrm(ks[5], (N_FILTERS, IN_CHANNELS, KERNEL_SIZE)), zeros((N_FILTERS,))
    # ConvMLP.fc1_xt as [in, out] = [F*L, O] with input index f*L + l (torch weight.T)
    p["w_fc1xt"], p["b_fc1xt"] = nrm(ks[6], (FC1_XT_DIM, PROT_OUT_DIM)), zeros((PROT_OUT_DIM,))
    # LayerNorms
    p["ln_conv_g"], p["ln_conv_b"] = ones((PROT_OUT_DIM,)), zeros((PROT_OUT_DIM,))
    p["ln_clf_g"], p["ln_clf_b"] = ones((GNN_EMB_DIM,)), zeros((GNN_EMB_DIM,))
    # head
    p["w_fc1"], p["b_fc1"] = nrm(ks[7], (CLF_IN_DIM, MLP_DIM1)), zeros((MLP_DIM1,))
    p["w_fc2"], p["b_fc2"] = nrm(ks[8], (MLP_DIM1, MLP_DIM2)), zeros((MLP_DIM2,))
    p["w_out"], p["b_out"] = nrm(ks[9], (MLP_DIM2, NUM_TASK)), zeros((NUM_TASK,))
    return p


def _fold_conv_fc1(w_conv, b_conv, w_fc1xt, b_fc1xt):
    """Fold Conv1d -> view(-1, F*L) -> fc1_xt into a single [C*E, O] linear map.

    out[b,o] = b_fc1xt[o] + sum_{f,l} (b_conv[f] + sum_{c,k} x[b,c,l+k] w_conv[f,c,k])
                                      * w_fc1xt[f*L + l, o]
    """
    Fo, C, K = w_conv.shape
    O = w_fc1xt.shape[1]
    hi = jax.lax.Precision.HIGHEST
    w_fc1_r = w_fc1xt.reshape(Fo, INTER_DIM, O)                 # [F, L, O]
    W = jnp.zeros((C, PROT_EMB_DIM, O), jnp.float32)
    for k in range(K):
        contrib = jnp.einsum("fc,flo->clo", w_conv[:, :, k], w_fc1_r, precision=hi)
        W = W.at[:, k:k + INTER_DIM, :].add(contrib)            # e = l + k
    b = b_fc1xt + jnp.einsum("f,flo->o", b_conv, w_fc1_r, precision=hi)
    return W.reshape(C * PROT_EMB_DIM, O), b


def _pad_row(v):
    v = jnp.asarray(v, jnp.float32).reshape(-1)
    return jnp.pad(v, (0, LANES - v.shape[0]))


def prepare_params(raw):
    """One-time init-side transform: fold conv+fc1_xt and pack everything into
    three contiguous slabs carved inside the kernel with static slices."""
    w_prot, b_prot = _fold_conv_fc1(raw["w_conv"], raw["b_conv"],
                                    raw["w_fc1xt"], raw["b_fc1xt"])
    prep = {"emb_xt": raw["emb_xt"]}

    # slab of all weights with 32 output lanes, stacked on rows (offsets _R_*)
    prep["w32"] = jnp.concatenate(
        [raw["w_pp1"], raw["w_pp2"], raw["w_pl1"], w_prot, raw["w_fc2"]], axis=0)
    assert prep["w32"].shape == (_R_W32_END, DG)

    # fc1 weight kept whole ([160, 64]); the kernel consumes its three row
    # slices directly (prompt rows / repr rows / xt rows), so no concat needed.
    prep["w64"] = raw["w_fc1"]

    # bias / LayerNorm / 1-column-weight slab: one [16, 128] tile pair
    vec_rows = [
        raw["b_pp1"], raw["b_pp2"], raw["b_pl1"], raw["w_pl2"][:, 0], raw["b_pl2"],
        b_prot, raw["ln_conv_g"], raw["ln_conv_b"],
        raw["ln_clf_g"][:DG], raw["ln_clf_b"][:DG],
        raw["ln_clf_g"][DG:], raw["ln_clf_b"][DG:],
        raw["b_fc1"], raw["b_fc2"], raw["w_out"][:, 0], raw["b_out"],
    ]
    assert len(vec_rows) == _N_VROWS
    prep["vslab"] = jnp.stack([_pad_row(v) for v in vec_rows], axis=0)
    return prep


# ----------------------------------------------------------------------------
# forward
# ----------------------------------------------------------------------------
def phar_dta_forward(prep, molecules_phar_prompt, molecule_repr, protein_tokens, atten):
    # TODO(synk): PharVQA.forward_tune / get_graph_feat and the DGL GNN backbone
    # are not in the provided source; `molecules_phar_prompt`, `atten`,
    # `molecule_repr` are taken as precomputed feature inputs.
    prompt_rows = molecules_phar_prompt.reshape(M_ROWS, DG)
    # Per-batch features are row-duplicated to the B*NQ rows the prompt_linear
    # branch needs: every matmul then runs at M=8 (one f32 sublane tile); the
    # duplicated rows are inside MXU minimum-tile padding anyway, so this is free.
    dup = lambda x: jnp.broadcast_to(x[:, None, :], (B, NQ, x.shape[-1])).reshape(M_ROWS, -1)
    prompt_flat = dup(molecules_phar_prompt.reshape(B, NQ * DG))
    mol_repr_rows = dup(molecule_repr)
    # nn.Embedding lookup (tiny gather) stays in XLA glue; everything downstream
    # runs inside the single fused Pallas kernel.
    emb_flat = prep["emb_xt"][protein_tokens].reshape(B, EMB_FLAT_DIM)
    emb_rows = dup(emb_flat)

    out = _fused_call(prompt_flat, prompt_rows, mol_repr_rows, emb_rows, prep)

    # lane 0 = pred (per question-row), lane 1 = interaction (identical across
    # the NQ duplicated rows of a batch; take q == 0).
    pred_phar_num = out[:, 0].reshape(B, NQ)
    interaction = out[::NQ, 1:2]                                  # [B, NUM_TASK]
    # torch casts pred_phar_num to float64; TPU has no native f64 datapath so we
    # keep float32 (cast on host if exact dtype parity is required).
    return interaction, pred_phar_num, atten


# ----------------------------------------------------------------------------
# pure-JAX reference of the ORIGINAL (unfolded) module math, for validation
# ----------------------------------------------------------------------------
def reference_forward(raw, molecules_phar_prompt, molecule_repr, protein_tokens, atten):
    hi = jax.lax.Precision.HIGHEST
    mm = functools.partial(jnp.matmul, precision=hi)
    gelu = functools.partial(jax.nn.gelu, approximate=False)
    ln = lambda x, g, b: ((x - x.mean(-1, keepdims=True))
                          / jnp.sqrt(x.var(-1, keepdims=True) + LN_EPS) * g + b)

    flat = molecules_phar_prompt.reshape(B, NQ * DG)
    mp = mm(gelu(mm(flat, raw["w_pp1"]) + raw["b_pp1"]), raw["w_pp2"]) + raw["b_pp2"]
    l1 = gelu(mm(molecules_phar_prompt, raw["w_pl1"]) + raw["b_pl1"])
    pred = (mm(l1, raw["w_pl2"]) + raw["b_pl2"])[..., 0]                  # [B, NQ]

    emb = raw["emb_xt"][protein_tokens]                                    # [B, C, E]
    conv = jax.lax.conv_general_dilated(
        emb, raw["w_conv"], window_strides=(1,), padding="VALID",
        dimension_numbers=("NCH", "OIH", "NCH"), precision=hi)
    conv = conv + raw["b_conv"][None, :, None]                             # [B, F, L]
    xt = mm(conv.reshape(B, FC1_XT_DIM), raw["w_fc1xt"]) + raw["b_fc1xt"]  # view(-1, F*L)
    xt = ln(xt, raw["ln_conv_g"], raw["ln_conv_b"])

    h = ln(jnp.concatenate([mp, molecule_repr], axis=-1), raw["ln_clf_g"], raw["ln_clf_b"])
    hcat = jnp.concatenate([h, xt], axis=1)
    z = jax.nn.relu(mm(hcat, raw["w_fc1"]) + raw["b_fc1"])
    z = jax.nn.relu(mm(z, raw["w_fc2"]) + raw["b_fc2"])
    out = mm(z, raw["w_out"]) + raw["b_out"]
    return out, pred, atten


# ----------------------------------------------------------------------------
if __name__ == "__main__":
    key = jax.random.PRNGKey(0)
    k_par, k_prompt, k_repr, k_prot, k_att = jax.random.split(key, 5)

    raw = init_raw_params(k_par)
    prep = prepare_params(raw)

    molecules_phar_prompt = jax.random.normal(k_prompt, (B, NQ, DG), dtype=jnp.float32)
    molecule_repr = jax.random.normal(k_repr, (B, 3 * DG), dtype=jnp.float32)
    protein_batch = jax.random.randint(k_prot, (B, IN_CHANNELS), 0, NUM_FEATURES + 1,
                                       dtype=jnp.int32)
    atten = jax.random.normal(k_att, (B, NQ, 8), dtype=jnp.float32)   # passthrough output

    fwd = jax.jit(phar_dta_forward)
    interaction, pred_phar_num, atten_out = fwd(prep, molecules_phar_prompt,
                                                molecule_repr, protein_batch, atten)
    jax.block_until_ready((interaction, pred_phar_num, atten_out))

    assert interaction.shape == (B, NUM_TASK) and interaction.dtype == jnp.float32
    assert pred_phar_num.shape == (B, NQ) and pred_phar_num.dtype == jnp.float32
    assert atten_out.shape == atten.shape

    # validate the fused/folded/packed kernel against the original (unfolded) math
    ref_inter, ref_pred, _ = jax.jit(reference_forward)(
        raw, molecules_phar_prompt, molecule_repr, protein_batch, atten)
    np.testing.assert_allclose(np.asarray(interaction), np.asarray(ref_inter),
                               atol=1e-3, rtol=1e-3)
    np.testing.assert_allclose(np.asarray(pred_phar_num), np.asarray(ref_pred),
                               atol=1e-3, rtol=1e-3)

    print("KERNEL_OK")
</pallas_src>

<mosaic_0001>
module attributes {stable_mosaic.version = 11 : i64} {
  func.func @_fused_forward_kernel(%arg0: memref<8x128xf32, #tpu.memory_space<vmem>>, %arg1: memref<8x32xf32, #tpu.memory_space<vmem>>, %arg2: memref<8x96xf32, #tpu.memory_space<vmem>>, %arg3: memref<8x512xf32, #tpu.memory_space<vmem>>, %arg4: memref<768x32xf32, #tpu.memory_space<vmem>>, %arg5: memref<160x64xf32, #tpu.memory_space<vmem>>, %arg6: memref<16x128xf32, #tpu.memory_space<vmem>>, %arg7: memref<8x128xf32, #tpu.memory_space<vmem>>) attributes {dimension_semantics = [], scalar_prefetch = 0 : i64, scratch_operands = 0 : i64, tpu.core_type = #tpu.core_type<tc>} {
    %c0 = arith.constant 0 : index
    %c0_0 = arith.constant 0 : index
    %0 = vector.load %arg0[%c0, %c0_0] : memref<8x128xf32, #tpu.memory_space<vmem>>, vector<8x128xf32>
    %c0_1 = arith.constant 0 : index
    %c0_2 = arith.constant 0 : index
    %1 = vector.load %arg4[%c0_1, %c0_2] : memref<768x32xf32, #tpu.memory_space<vmem>>, vector<128x32xf32>
    %cst = arith.constant dense<0.000000e+00> : vector<8x32xf32>
    %2 = tpu.matmul %0, %1, %cst {dimension_numbers = #tpu.dot_dimension_numbers<[1], [0], [0], [1], [0, 0, 1, 1], [], []>} : vector<8x128xf32>, vector<128x32xf32>, vector<8x32xf32> -> vector<8x32xf32>
    %c0_3 = arith.constant 0 : index
    %c0_4 = arith.constant 0 : index
    %3 = vector.load %arg6[%c0_3, %c0_4] : memref<16x128xf32, #tpu.memory_space<vmem>>, vector<1x32xf32>
    %4 = vector.broadcast %3 : vector<1x32xf32> to vector<8x32xf32>
    %5 = arith.addf %2, %4 : vector<8x32xf32>
    %cst_5 = arith.constant 5.000000e-01 : f32
    %6 = vector.broadcast %cst_5 : f32 to vector<8x32xf32>
    %7 = arith.mulf %6, %5 : vector<8x32xf32>
    %cst_6 = arith.constant 0.707106769 : f32
    %8 = vector.broadcast %cst_6 : f32 to vector<8x32xf32>
    %9 = arith.mulf %5, %8 : vector<8x32xf32>
    %cst_7 = arith.constant 0.000000e+00 : f32
    %10 = vector.broadcast %cst_7 : f32 to vector<8x32xf32>
    %11 = arith.cmpf oge, %9, %10 : vector<8x32xf32>
    %cst_8 = arith.constant 1.000000e+00 : f32
    %cst_9 = arith.constant -1.000000e+00 : f32
    %12 = vector.broadcast %cst_8 : f32 to vector<8x32xf32>
    %13 = vector.broadcast %cst_9 : f32 to vector<8x32xf32>
    %14 = arith.select %11, %12, %13 : vector<8x32xi1>, vector<8x32xf32>
    %15 = math.absf %9 : vector<8x32xf32>
    %cst_10 = arith.constant 0.327591091 : f32
    %16 = vector.broadcast %cst_10 : f32 to vector<8x32xf32>
    %17 = arith.mulf %16, %15 : vector<8x32xf32>
    %cst_11 = arith.constant 1.000000e+00 : f32
    %18 = vector.broadcast %cst_11 : f32 to vector<8x32xf32>
    %19 = arith.addf %18, %17 : vector<8x32xf32>
    %20 = tpu.reciprocal %19 {approx = true} : vector<8x32xf32> -> vector<8x32xf32>
    %cst_12 = arith.constant 1.06140542 : f32
    %21 = vector.broadcast %cst_12 : f32 to vector<8x32xf32>
    %22 = arith.mulf %20, %21 : vector<8x32xf32>
    %cst_13 = arith.constant -1.45315206 : f32
    %23 = vector.broadcast %cst_13 : f32 to vector<8x32xf32>
    %24 = arith.addf %23, %22 : vector<8x32xf32>
    %25 = arith.mulf %20, %24 : vector<8x32xf32>
    %cst_14 = arith.constant 1.42141378 : f32
    %26 = vector.broadcast %cst_14 : f32 to vector<8x32xf32>
    %27 = arith.addf %26, %25 : vector<8x32xf32>
    %28 = arith.mulf %20, %27 : vector<8x32xf32>
    %cst_15 = arith.constant -0.284496725 : f32
    %29 = vector.broadcast %cst_15 : f32 to vector<8x32xf32>
    %30 = arith.addf %29, %28 : vector<8x32xf32>
    %31 = arith.mulf %20, %30 : vector<8x32xf32>
    %cst_16 = arith.constant 0.254829586 : f32
    %32 = vector.broadcast %cst_16 : f32 to vector<8x32xf32>
    %33 = arith.addf %32, %31 : vector<8x32xf32>
    %34 = arith.mulf %20, %33 : vector<8x32xf32>
    %cst_17 = arith.constant 0.000000e+00 : f32
    %35 = vector.broadcast %cst_17 : f32 to vector<8x32xf32>
    %36 = arith.subf %35, %15 : vector<8x32xf32>
    %37 = arith.mulf %36, %15 : vector<8x32xf32>
    %38 = math.exp %37 : vector<8x32xf32>
    %39 = arith.mulf %34, %38 : vector<8x32xf32>
    %cst_18 = arith.constant 1.000000e+00 : f32
    %40 = vector.broadcast %cst_18 : f32 to vector<8x32xf32>
    %41 = arith.subf %40, %39 : vector<8x32xf32>
    %42 = arith.mulf %14, %41 : vector<8x32xf32>
    %cst_19 = arith.constant 1.000000e+00 : f32
    %43 = vector.broadcast %cst_19 : f32 to vector<8x32xf32>
    %44 = arith.addf %43, %42 : vector<8x32xf32>
    %45 = arith.mulf %7, %44 : vector<8x32xf32>
    %c128 = arith.constant 128 : index
    %c0_20 = arith.constant 0 : index
    %46 = vector.load %arg4[%c128, %c0_20] : memref<768x32xf32, #tpu.memory_space<vmem>>, vector<32x32xf32>
    %cst_21 = arith.constant dense<0.000000e+00> : vector<8x32xf32>
    %47 = tpu.matmul %45, %46, %cst_21 {dimension_numbers = #tpu.dot_dimension_numbers<[1], [0], [0], [1], [0, 0, 1, 1], [], []>} : vector<8x32xf32>, vector<32x32xf32>, vector<8x32xf32> -> vector<8x32xf32>
    %c1 = arith.constant 1 : index
    %c0_22 = arith.constant 0 : index
    %48 = vector.load %arg6[%c1, %c0_22] : memref<16x128xf32, #tpu.memory_space<vmem>>, vector<1x32xf32>
    %49 = vector.broadcast %48 : vector<1x32xf32> to vector<8x32xf32>
    %50 = arith.addf %47, %49 : vector<8x32xf32>
    %c0_23 = arith.constant 0 : index
    %c0_24 = arith.constant 0 : index
    %51 = vector.load %arg1[%c0_23, %c0_24] : memref<8x32xf32, #tpu.memory_space<vmem>>, vector<8x32xf32>
    %c160 = arith.constant 160 : index
    %c0_25 = arith.constant 0 : index
    %52 = vector.load %arg4[%c160, %c0_25] : memref<768x32xf32, #tpu.memory_space<vmem>>, vector<32x32xf32>
    %cst_26 = arith.constant dense<0.000000e+00> : vector<8x32xf32>
    %53 = tpu.matmul %51, %52, %cst_26 {dimension_numbers = #tpu.dot_dimension_numbers<[1], [0], [0], [1], [0, 0, 1, 1], [], []>} : vector<8x32xf32>, vector<32x32xf32>, vector<8x32xf32> -> vector<8x32xf32>
    %c2 = arith.constant 2 : index
    %c0_27 = arith.constant 0 : index
    %54 = vector.load %arg6[%c2, %c0_27] : memref<16x128xf32, #tpu.memory_space<vmem>>, vector<1x32xf32>
    %55 = vector.broadcast %54 : vector<1x32xf32> to vector<8x32xf32>
    %56 = arith.addf %53, %55 : vector<8x32xf32>
    %cst_28 = arith.constant 5.000000e-01 : f32
    %57 = vector.broadcast %cst_28 : f32 to vector<8x32xf32>
    %58 = arith.mulf %57, %56 : vector<8x32xf32>
    %cst_29 = arith.constant 0.707106769 : f32
    %59 = vector.broadcast %cst_29 : f32 to vector<8x32xf32>
    %60 = arith.mulf %56, %59 : vector<8x32xf32>
    %cst_30 = arith.constant 0.000000e+00 : f32
    %61 = vector.broadcast %cst_30 : f32 to vector<8x32xf32>
    %62 = arith.cmpf oge, %60, %61 : vector<8x32xf32>
    %cst_31 = arith.constant 1.000000e+00 : f32
    %cst_32 = arith.constant -1.000000e+00 : f32
    %63 = vector.broadcast %cst_31 : f32 to vector<8x32xf32>
    %64 = vector.broadcast %cst_32 : f32 to vector<8x32xf32>
    %65 = arith.select %62, %63, %64 : vector<8x32xi1>, vector<8x32xf32>
    %66 = math.absf %60 : vector<8x32xf32>
    %cst_33 = arith.constant 0.327591091 : f32
    %67 = vector.broadcast %cst_33 : f32 to vector<8x32xf32>
    %68 = arith.mulf %67, %66 : vector<8x32xf32>
    %cst_34 = arith.constant 1.000000e+00 : f32
    %69 = vector.broadcast %cst_34 : f32 to vector<8x32xf32>
    %70 = arith.addf %69, %68 : vector<8x32xf32>
    %71 = tpu.reciprocal %70 {approx = true} : vector<8x32xf32> -> vector<8x32xf32>
    %cst_35 = arith.constant 1.06140542 : f32
    %72 = vector.broadcast %cst_35 : f32 to vector<8x32xf32>
    %73 = arith.mulf %71, %72 : vector<8x32xf32>
    %cst_36 = arith.constant -1.45315206 : f32
    %74 = vector.broadcast %cst_36 : f32 to vector<8x32xf32>
    %75 = arith.addf %74, %73 : vector<8x32xf32>
    %76 = arith.mulf %71, %75 : vector<8x32xf32>
    %cst_37 = arith.constant 1.42141378 : f32
    %77 = vector.broadcast %cst_37 : f32 to vector<8x32xf32>
    %78 = arith.addf %77, %76 : vector<8x32xf32>
    %79 = arith.mulf %71, %78 : vector<8x32xf32>
    %cst_38 = arith.constant -0.284496725 : f32
    %80 = vector.broadcast %cst_38 : f32 to vector<8x32xf32>
    %81 = arith.addf %80, %79 : vector<8x32xf32>
    %82 = arith.mulf %71, %81 : vector<8x32xf32>
    %cst_39 = arith.constant 0.254829586 : f32
    %83 = vector.broadcast %cst_39 : f32 to vector<8x32xf32>
    %84 = arith.addf %83, %82 : vector<8x32xf32>
    %85 = arith.mulf %71, %84 : vector<8x32xf32>
    %cst_40 = arith.constant 0.000000e+00 : f32
    %86 = vector.broadcast %cst_40 : f32 to vector<8x32xf32>
    %87 = arith.subf %86, %66 : vector<8x32xf32>
    %88 = arith.mulf %87, %66 : vector<8x32xf32>
    %89 = math.exp %88 : vector<8x32xf32>
    %90 = arith.mulf %85, %89 : vector<8x32xf32>
    %cst_41 = arith.constant 1.000000e+00 : f32
    %91 = vector.broadcast %cst_41 : f32 to vector<8x32xf32>
    %92 = arith.subf %91, %90 : vector<8x32xf32>
    %93 = arith.mulf %65, %92 : vector<8x32xf32>
    %cst_42 = arith.constant 1.000000e+00 : f32
    %94 = vector.broadcast %cst_42 : f32 to vector<8x32xf32>
    %95 = arith.addf %94, %93 : vector<8x32xf32>
    %96 = arith.mulf %58, %95 : vector<8x32xf32>
    %c3 = arith.constant 3 : index
    %c0_43 = arith.constant 0 : index
    %97 = vector.load %arg6[%c3, %c0_43] : memref<16x128xf32, #tpu.memory_space<vmem>>, vector<1x32xf32>
    %98 = vector.broadcast %97 : vector<1x32xf32> to vector<8x32xf32>
    %99 = arith.mulf %96, %98 : vector<8x32xf32>
    %cst_44 = arith.constant dense<0.000000e+00> : vector<8xf32>
    %100 = vector.multi_reduction <add>, %99, %cst_44 [1] : vector<8x32xf32> to vector<8xf32>
    %101 = vector.shape_cast %100 : vector<8xf32> to vector<8x1xf32>
    %c4 = arith.constant 4 : index
    %c0_45 = arith.constant 0 : index
    %102 = vector.load %arg6[%c4, %c0_45] : memref<16x128xf32, #tpu.memory_space<vmem>>, vector<1x1xf32>
    %103 = vector.broadcast %102 : vector<1x1xf32> to vector<8x1xf32>
    %104 = arith.addf %101, %103 : vector<8x1xf32>
    %c0_46 = arith.constant 0 : index
    %c0_47 = arith.constant 0 : index
    %105 = vector.load %arg3[%c0_46, %c0_47] : memref<8x512xf32, #tpu.memory_space<vmem>>, vector<8x512xf32>
    %c192 = arith.constant 192 : index
    %c0_48 = arith.constant 0 : index
    %106 = vector.load %arg4[%c192, %c0_48] : memref<768x32xf32, #tpu.memory_space<vmem>>, vector<512x32xf32>
    %cst_49 = arith.constant dense<0.000000e+00> : vector<8x32xf32>
    %107 = tpu.matmul %105, %106, %cst_49 {dimension_numbers = #tpu.dot_dimension_numbers<[1], [0], [0], [1], [0, 0, 1, 1], [], []>} : vector<8x512xf32>, vector<512x32xf32>, vector<8x32xf32> -> vector<8x32xf32>
    %c5 = arith.constant 5 : index
    %c0_50 = arith.constant 0 : index
    %108 = vector.load %arg6[%c5, %c0_50] : memref<16x128xf32, #tpu.memory_space<vmem>>, vector<1x32xf32>
    %109 = vector.broadcast %108 : vector<1x32xf32> to vector<8x32xf32>
    %110 = arith.addf %107, %109 : vector<8x32xf32>
    %c6 = arith.constant 6 : index
    %c0_51 = arith.constant 0 : index
    %111 = vector.load %arg6[%c6, %c0_51] : memref<16x128xf32, #tpu.memory_space<vmem>>, vector<1x32xf32>
    %c7 = arith.constant 7 : index
    %c0_52 = arith.constant 0 : index
    %112 = vector.load %arg6[%c7, %c0_52] : memref<16x128xf32, #tpu.memory_space<vmem>>, vector<1x32xf32>
    %cst_53 = arith.constant dense<0.000000e+00> : vector<8xf32>
    %113 = vector.multi_reduction <add>, %110, %cst_53 [1] : vector<8x32xf32> to vector<8xf32>
    %114 = vector.shape_cast %113 : vector<8xf32> to vector<8x1xf32>
    %cst_54 = arith.constant 3.200000e+01 : f32
    %115 = vector.broadcast %cst_54 : f32 to vector<8x1xf32>
    %116 = arith.divf %114, %115 : vector<8x1xf32>
    %117 = vector.broadcast %116 : vector<8x1xf32> to vector<8x32xf32>
    %118 = arith.subf %110, %117 : vector<8x32xf32>
    %119 = arith.mulf %118, %118 : vector<8x32xf32>
    %cst_55 = arith.constant dense<0.000000e+00> : vector<8xf32>
    %120 = vector.multi_reduction <add>, %119, %cst_55 [1] : vector<8x32xf32> to vector<8xf32>
    %121 = vector.shape_cast %120 : vector<8xf32> to vector<8x1xf32>
    %cst_56 = arith.constant 3.200000e+01 : f32
    %122 = vector.broadcast %cst_56 : f32 to vector<8x1xf32>
    %123 = arith.divf %121, %122 : vector<8x1xf32>
    %cst_57 = arith.constant 9.99999974E-6 : f32
    %124 = vector.broadcast %cst_57 : f32 to vector<8x1xf32>
    %125 = arith.addf %123, %124 : vector<8x1xf32>
    %126 = math.rsqrt %125 : vector<8x1xf32>
    %127 = vector.broadcast %126 : vector<8x1xf32> to vector<8x32xf32>
    %128 = arith.mulf %118, %127 : vector<8x32xf32>
    %129 = vector.broadcast %111 : vector<1x32xf32> to vector<8x32xf32>
    %130 = arith.mulf %128, %129 : vector<8x32xf32>
    %131 = vector.broadcast %112 : vector<1x32xf32> to vector<8x32xf32>
    %132 = arith.addf %130, %131 : vector<8x32xf32>
    %c0_58 = arith.constant 0 : index
    %c0_59 = arith.constant 0 : index
    %133 = vector.load %arg2[%c0_58, %c0_59] : memref<8x96xf32, #tpu.memory_space<vmem>>, vector<8x96xf32>
    %cst_60 = arith.constant dense<0.000000e+00> : vector<8xf32>
    %134 = vector.multi_reduction <add>, %50, %cst_60 [1] : vector<8x32xf32> to vector<8xf32>
    %135 = vector.shape_cast %134 : vector<8xf32> to vector<8x1xf32>
    %cst_61 = arith.constant dense<0.000000e+00> : vector<8xf32>
    %136 = vector.multi_reduction <add>, %133, %cst_61 [1] : vector<8x96xf32> to vector<8xf32>
    %137 = vector.shape_cast %136 : vector<8xf32> to vector<8x1xf32>
    %138 = arith.addf %135, %137 : vector<8x1xf32>
    %cst_62 = arith.constant 7.812500e-03 : f32
    %139 = vector.broadcast %cst_62 : f32 to vector<8x1xf32>
    %140 = arith.mulf %138, %139 : vector<8x1xf32>
    %141 = vector.broadcast %140 : vector<8x1xf32> to vector<8x32xf32>
    %142 = arith.subf %50, %141 : vector<8x32xf32>
    %143 = vector.broadcast %140 : vector<8x1xf32> to vector<8x96xf32>
    %144 = arith.subf %133, %143 : vector<8x96xf32>
    %145 = arith.mulf %142, %142 : vector<8x32xf32>
    %cst_63 = arith.constant dense<0.000000e+00> : vector<8xf32>
    %146 = vector.multi_reduction <add>, %145, %cst_63 [1] : vector<8x32xf32> to vector<8xf32>
    %147 = vector.shape_cast %146 : vector<8xf32> to vector<8x1xf32>
    %148 = arith.mulf %144, %144 : vector<8x96xf32>
    %cst_64 = arith.constant dense<0.000000e+00> : vector<8xf32>
    %149 = vector.multi_reduction <add>, %148, %cst_64 [1] : vector<8x96xf32> to vector<8xf32>
    %150 = vector.shape_cast %149 : vector<8xf32> to vector<8x1xf32>
    %151 = arith.addf %147, %150 : vector<8x1xf32>
    %cst_65 = arith.constant 7.812500e-03 : f32
    %152 = vector.broadcast %cst_65 : f32 to vector<8x1xf32>
    %153 = arith.mulf %151, %152 : vector<8x1xf32>
    %cst_66 = arith.constant 9.99999974E-6 : f32
    %154 = vector.broadcast %cst_66 : f32 to vector<8x1xf32>
    %155 = arith.addf %153, %154 : vector<8x1xf32>
    %156 = math.rsqrt %155 : vector<8x1xf32>
    %157 = vector.broadcast %156 : vector<8x1xf32> to vector<8x32xf32>
    %158 = arith.mulf %142, %157 : vector<8x32xf32>
    %c8 = arith.constant 8 : index
    %c0_67 = arith.constant 0 : index
    %159 = vector.load %arg6[%c8, %c0_67] : memref<16x128xf32, #tpu.memory_space<vmem>>, vector<1x32xf32>
    %160 = vector.broadcast %159 : vector<1x32xf32> to vector<8x32xf32>
    %161 = arith.mulf %158, %160 : vector<8x32xf32>
    %c9 = arith.constant 9 : index
    %c0_68 = arith.constant 0 : index
    %162 = vector.load %arg6[%c9, %c0_68] : memref<16x128xf32, #tpu.memory_space<vmem>>, vector<1x32xf32>
    %163 = vector.broadcast %162 : vector<1x32xf32> to vector<8x32xf32>
    %164 = arith.addf %161, %163 : vector<8x32xf32>
    %165 = vector.broadcast %156 : vector<8x1xf32> to vector<8x96xf32>
    %166 = arith.mulf %144, %165 : vector<8x96xf32>
    %c10 = arith.constant 10 : index
    %c0_69 = arith.constant 0 : index
    %167 = vector.load %arg6[%c10, %c0_69] : memref<16x128xf32, #tpu.memory_space<vmem>>, vector<1x96xf32>
    %168 = vector.broadcast %167 : vector<1x96xf32> to vector<8x96xf32>
    %169 = arith.mulf %166, %168 : vector<8x96xf32>
    %c11 = arith.constant 11 : index
    %c0_70 = arith.constant 0 : index
    %170 = vector.load %arg6[%c11, %c0_70] : memref<16x128xf32, #tpu.memory_space<vmem>>, vector<1x96xf32>
    %171 = vector.broadcast %170 : vector<1x96xf32> to vector<8x96xf32>
    %172 = arith.addf %169, %171 : vector<8x96xf32>
    %c0_71 = arith.constant 0 : index
    %c0_72 = arith.constant 0 : index
    %173 = vector.load %arg5[%c0_71, %c0_72] : memref<160x64xf32, #tpu.memory_space<vmem>>, vector<32x64xf32>
    %cst_73 = arith.constant dense<0.000000e+00> : vector<8x64xf32>
    %174 = tpu.matmul %164, %173, %cst_73 {dimension_numbers = #tpu.dot_dimension_numbers<[1], [0], [0], [1], [0, 0, 1, 1], [], []>} : vector<8x32xf32>, vector<32x64xf32>, vector<8x64xf32> -> vector<8x64xf32>
    %c32 = arith.constant 32 : index
    %c0_74 = arith.constant 0 : index
    %175 = vector.load %arg5[%c32, %c0_74] : memref<160x64xf32, #tpu.memory_space<vmem>>, vector<96x64xf32>
    %cst_75 = arith.constant dense<0.000000e+00> : vector<8x64xf32>
    %176 = tpu.matmul %172, %175, %cst_75 {dimension_numbers = #tpu.dot_dimension_numbers<[1], [0], [0], [1], [0, 0, 1, 1], [], []>} : vector<8x96xf32>, vector<96x64xf32>, vector<8x64xf32> -> vector<8x64xf32>
    %177 = arith.addf %174, %176 : vector<8x64xf32>
    %c128_76 = arith.constant 128 : index
    %c0_77 = arith.constant 0 : index
    %178 = vector.load %arg5[%c128_76, %c0_77] : memref<160x64xf32, #tpu.memory_space<vmem>>, vector<32x64xf32>
    %cst_78 = arith.constant dense<0.000000e+00> : vector<8x64xf32>
    %179 = tpu.matmul %132, %178, %cst_78 {dimension_numbers = #tpu.dot_dimension_numbers<[1], [0], [0], [1], [0, 0, 1, 1], [], []>} : vector<8x32xf32>, vector<32x64xf32>, vector<8x64xf32> -> vector<8x64xf32>
    %180 = arith.addf %177, %179 : vector<8x64xf32>
    %c12 = arith.constant 12 : index
    %c0_79 = arith.constant 0 : index
    %181 = vector.load %arg6[%c12, %c0_79] : memref<16x128xf32, #tpu.memory_space<vmem>>, vector<1x64xf32>
    %182 = vector.broadcast %181 : vector<1x64xf32> to vector<8x64xf32>
    %183 = arith.addf %180, %182 : vector<8x64xf32>
    %cst_80 = arith.constant 0.000000e+00 : f32
    %184 = vector.broadcast %cst_80 : f32 to vector<8x64xf32>
    %185 = arith.maximumf %183, %184 : vector<8x64xf32>
    %c704 = arith.constant 704 : index
    %c0_81 = arith.constant 0 : index
    %186 = vector.load %arg4[%c704, %c0_81] : memref<768x32xf32, #tpu.memory_space<vmem>>, vector<64x32xf32>
    %cst_82 = arith.constant dense<0.000000e+00> : vector<8x32xf32>
    %187 = tpu.matmul %185, %186, %cst_82 {dimension_numbers = #tpu.dot_dimension_numbers<[1], [0], [0], [1], [0, 0, 1, 1], [], []>} : vector<8x64xf32>, vector<64x32xf32>, vector<8x32xf32> -> vector<8x32xf32>
    %c13 = arith.constant 13 : index
    %c0_83 = arith.constant 0 : index
    %188 = vector.load %arg6[%c13, %c0_83] : memref<16x128xf32, #tpu.memory_space<vmem>>, vector<1x32xf32>
    %189 = vector.broadcast %188 : vector<1x32xf32> to vector<8x32xf32>
    %190 = arith.addf %187, %189 : vector<8x32xf32>
    %cst_84 = arith.constant 0.000000e+00 : f32
    %191 = vector.broadcast %cst_84 : f32 to vector<8x32xf32>
    %192 = arith.maximumf %190, %191 : vector<8x32xf32>
    %c14 = arith.constant 14 : index
    %c0_85 = arith.constant 0 : index
    %193 = vector.load %arg6[%c14, %c0_85] : memref<16x128xf32, #tpu.memory_space<vmem>>, vector<1x32xf32>
    %194 = vector.broadcast %193 : vector<1x32xf32> to vector<8x32xf32>
    %195 = arith.mulf %192, %194 : vector<8x32xf32>
    %cst_86 = arith.constant dense<0.000000e+00> : vector<8xf32>
    %196 = vector.multi_reduction <add>, %195, %cst_86 [1] : vector<8x32xf32> to vector<8xf32>
    %197 = vector.shape_cast %196 : vector<8xf32> to vector<8x1xf32>
    %c15 = arith.constant 15 : index
    %c0_87 = arith.constant 0 : index
    %198 = vector.load %arg6[%c15, %c0_87] : memref<16x128xf32, #tpu.memory_space<vmem>>, vector<1x1xf32>
    %199 = vector.broadcast %198 : vector<1x1xf32> to vector<8x1xf32>
    %200 = arith.addf %197, %199 : vector<8x1xf32>
    %201 = tpu.iota {dimensions = array<i32: 1>} : vector<8x128xi32>
    %c0_i32 = arith.constant 0 : i32
    %202 = vector.broadcast %c0_i32 : i32 to vector<8x128xi32>
    %203 = arith.cmpi eq, %201, %202 : vector<8x128xi32>
    %c1_i32 = arith.constant 1 : i32
    %204 = vector.broadcast %c1_i32 : i32 to vector<8x128xi32>
    %205 = arith.cmpi eq, %201, %204 : vector<8x128xi32>
    %cst_88 = arith.constant 0.000000e+00 : f32
    %206 = vector.shape_cast %200 : vector<8x1xf32> to vector<8x1xf32>
    %207 = vector.broadcast %206 : vector<8x1xf32> to vector<8x128xf32>
    %208 = vector.broadcast %cst_88 : f32 to vector<8x128xf32>
    %209 = arith.select %205, %207, %208 : vector<8x128xi1>, vector<8x128xf32>
    %210 = vector.shape_cast %104 : vector<8x1xf32> to vector<8x1xf32>
    %211 = vector.broadcast %210 : vector<8x1xf32> to vector<8x128xf32>
    %212 = arith.select %203, %211, %209 : vector<8x128xi1>, vector<8x128xf32>
    %c0_89 = arith.constant 0 : index
    %c0_90 = arith.constant 0 : index
    %213 = vector.load %arg7[%c0_89, %c0_90] : memref<8x128xf32, #tpu.memory_space<vmem>>, vector<8x128xf32>
    tpu.vector_store %arg7[%c0_89, %c0_90], %212 {strides = array<i32>} : memref<8x128xf32, #tpu.memory_space<vmem>>, vector<8x128xf32>,
    return
  }
}

</mosaic_0001>

<bundles_post_ra>
// kernel: squeeze.1
= control target key start
LH: loop header
LB: loop body
LE: loop exit
PB: predicated region body
PF: predicated region fallthrough
CT: control target
= control target key end

     0   :  { %s85_s0 = inlined_call_operand.vmem [shape: f32[8], index: 0, kind: input, shape index: {}]   ;;  %s86_s1 = inlined_call_operand.hbm [shape: f32[2,4], index: 1, kind: output, shape index: {}]  }
   0x1   :  { %v5_v0 = vld [vmem:[%s85_s0] sm:$0x1] }
   0x2   :  { %2 = vsyncpa [#allocation1], 0  ;;  %6 = vst [vmem:[#allocation3] sm:$0x1] %v5_v0  ;;  %vm8_vm0 = vcmask 31744   ;;  %s58_s0 = smov 124  }
   0x3   :  { %s59_s8 = smov [#allocation0]  }
   0x4   :  { %s26_s9 = sshll.u32 %s59_s8, 4  ;;  %s27_s9 = int_to_ptr.vmem [resolvable:$true] %s26_s9 }
   0x5   :  { %s34_s10 = scalar_lea.vmem %s27_s9, 32  ;;  %p39_p1 = scmp.lt.s32.totalorder %s27_s9, %s27_s9 }
   0x6   :  { %p35_p0 = scmp.ne.s32.totalorder %s27_s9, %s34_s10  ;;  %p40_p2 = scmp.lt.s32.totalorder %s34_s10, %s34_s10 }
   0x8   :  { %p41_p3 = por %p40_p2, %p39_p1 }
   0x9   :  { %v10_v1 = vld [vmem:[#allocation3] sm:$0x1]  }
   0xa   :  { %v7_v2 = vld [vmem:[#allocation3] sm:$0x1]   ;;  %11 = vrot.lane.b32.xlu0 %v10_v1, %s58_s0  ;;  %p42_p4 = pnand %p41_p3, %p35_p0 }
   0xb   :  { %9 = vst.msk [vmem:[#allocation2] sm:$0x1] %vm8_vm0, %v7_v2  }
  0x7c   :  { %v12_v3 = vpop.permute.xlu0 %11  }
  0x7d   :  { %15 = vst.msk [vmem:[#allocation2 + $0x1] sm:$0x1] %vm8_vm0, %v12_v3  }
  0x84   :  { %v19_v4 = vld [vmem:[#allocation2] sm:$0x3] }
  0x85   :  { %21 = vst [vmem:[#allocation0] sm:$0x3] %v19_v4 }
  0x86   :  { %45 = shalt.err (!%p42_p4)
}
  0x87   :  { %s46_s13 = scalar_lea.hbm %s86_s1, 32 }
  0x88   :  { %p47_p5 = scmp.ne.s32.totalorder %s86_s1, %s46_s13  ;;  %p50_p6 = scmp.lt.u32.totalorder %s46_s13, %s86_s1 }
  0x8a   :  { %p52_p7 = pnand %p50_p6, %p47_p5 }
  0x8c   :  { %55 = shalt.err (!%p52_p7)
}
  0x8d   :  { %29 = dma.vmem_to_hbm [thread:$0]  %s27_s9, 32, %s86_s1, [#allocation1]  }
  0x8e   :  { %56 = dma.done.wait [#allocation1], 32  }
  0x8f   :  { %57 = vsyncadd [#allocation1], 4294967264 }
  0x90   :  { %31 = vsyncpa [#allocation1], 1 }

// kernel: phar_dta_forward.1
= control target key start
LH: loop header
LB: loop body
LE: loop exit
PB: predicated region body
PF: predicated region fallthrough
CT: control target
= control target key end

     0   :  { %v1448_v0 = vmov 0.0|0.0   ;;  %vm1449_vm0 = vmmov 0   ;;  %v1450_v4 = vmov 0.0   ;;  %vm153_vm2 = vcmask 261120   ;;  %s1986_s4 = inlined_call_operand.vmem [shape: f32[768,32], index: 4, kind: input, shape index: {}]   ;;  %s1987_s0 = inlined_call_operand.vmem [shape: f32[8,128], index: 0, kind: input, shape index: {}]   ;;  %s1988_s3 = inlined_call_operand.vmem [shape: f32[8,512], index: 3, kind: input, shape index: {}]   ;;  %s1989_s6 = inlined_call_operand.vmem [shape: f32[16,128], index: 6, kind: input, shape index: {}]   ;;  %s1990_s1 = inlined_call_operand.vmem [shape: f32[8,32], index: 1, kind: input, shape index: {}]   ;;  %s1991_s2 = inlined_call_operand.vmem [shape: f32[8,96], index: 2, kind: input, shape index: {}]   ;;  %s1992_s5 = inlined_call_operand.vmem [shape: f32[160,64], index: 5, kind: input, shape index: {}]   ;;  %s1993_s7 = inlined_call_operand.vmem [shape: f32[8,128], index: 7, kind: output, shape index: {}]  }
   0x1   :  { %1287 = vmatprep.subr.bf16.mxu0 %v1448_v0  ;;  %v27_v1 = vld [vmem:[%s1986_s4] sm:$0xff]  ;;  %v28_v2 = vld [vmem:[%s1986_s4 + $0x8] sm:$0xff]  ;;  %v29_v3 = vld [vmem:[%s1986_s4 + $0x10] sm:$0xff]  ;;  %1194 = vmatprep.mubr.msk.f32.mxu0 %vm1449_vm0, %v1450_v4  ;;  %vm594_vm3 = vcmask 785408   ;;  %vm900_vm5 = vcmask 523264  }
   0x2   :  { %v1288_v5 = vpack.c.bf16 %v28_v2, %v27_v1  ;;  %v30_v6 = vld [vmem:[%s1986_s4 + $0x18] sm:$0xff]  ;;  %1311 = vmatprep.subr.bf16.mxu1 %v1448_v0  ;;  %1205 = vmatprep.mubr.msk.f32.mxu1 %vm1449_vm0, %v1450_v4  ;;  %v31_v8 = vld [vmem:[%s1986_s4 + $0x20] sm:$0xff]  ;;  %v32_v9 = vld [vmem:[%s1986_s4 + $0x28] sm:$0xff] }
   0x3   :  { %v1291_v7 = vpack.c.bf16 %v30_v6, %v29_v3  ;;  %v1294_v10 = vpack.c.bf16 %v32_v9, %v31_v8  ;;  %v33_v11 = vld [vmem:[%s1986_s4 + $0x30] sm:$0xff]  ;;  %v34_v12 = vld [vmem:[%s1986_s4 + $0x38] sm:$0xff]  ;;  %v35_v14 = vld [vmem:[%s1986_s4 + $0x40] sm:$0xff] }
   0x4   :  { %1289 = vmatpush3.bf16.msra.mxu0 %v1288_v5  ;;  %v1297_v13 = vpack.c.bf16 %v34_v12, %v33_v11  ;;  %v36_v15 = vld [vmem:[%s1986_s4 + $0x48] sm:$0xff]  ;;  %v37_v17 = vld [vmem:[%s1986_s4 + $0x50] sm:$0xff]  ;;  %v38_v18 = vld [vmem:[%s1986_s4 + $0x58] sm:$0xff] }
   0x5   :  { %1290 = vmatprep.subr.bf16.mxu0 %v1448_v0  ;;  %v1300_v16 = vpack.c.bf16 %v36_v15, %v35_v14  ;;  %v1303_v19 = vpack.c.bf16 %v38_v18, %v37_v17  ;;  %v39_v20 = vld [vmem:[%s1986_s4 + $0x60] sm:$0xff]  ;;  %v40_v21 = vld [vmem:[%s1986_s4 + $0x68] sm:$0xff]  ;;  %v41_v23 = vld [vmem:[%s1986_s4 + $0x70] sm:$0xff] }
   0x6   :  { %v1306_v22 = vpack.c.bf16 %v40_v21, %v39_v20  ;;  %v42_v24 = vld [vmem:[%s1986_s4 + $0x78] sm:$0xff]  ;;  %v26_v26 = vld [vmem:[%s1987_s0] sm:$0xff]  ;;  %v145_v28 = vld [vmem:[%s1986_s4 + $0x88] sm:$0xff] }
   0x7   :  { %v1309_v25 = vpack.c.bf16 %v42_v24, %v41_v23  ;;  %v144_v27 = vld [vmem:[%s1986_s4 + $0x80] sm:$0xff]  ;;  %v146_v30 = vld [vmem:[%s1986_s4 + $0x90] sm:$0xff]  ;;  %v147_v31 = vld [vmem:[%s1986_s4 + $0x98] sm:$0xff] }
   0x8   :  { %1292 = vmatpush3.bf16.msra.mxu0 %v1291_v7  ;;  %v1312_v29 = vpack.c.bf16 %v145_v28, %v144_v27  ;;  %v1315_v32 = vpack.c.bf16 %v147_v31, %v146_v30  ;;  %v403_v33 = vld [vmem:[%s1986_s4 + $0x240] sm:$0xff]  ;;  %v404_v34 = vld [vmem:[%s1986_s4 + $0x248] sm:$0xff]  ;;  %v405_v39 = vld [vmem:[%s1986_s4 + $0x250] sm:$0xff] }
   0x9   :  { %1293 = vmatprep.subr.bf16.mxu0 %v1448_v0  ;;  %v387_v35 = vld [vmem:[%s1986_s4 + $0x1c0] sm:$0xff]  ;;  %v1355_v36 = vpack.c.bf16 %v404_v34, %v403_v33  ;;  %v388_v37 = vld [vmem:[%s1986_s4 + $0x1c8] sm:$0xff]  ;;  %v406_v40 = vld [vmem:[%s1986_s4 + $0x258] sm:$0xff] }
   0xa   :  { %1313 = vmatpush3.bf16.msra.mxu1 %v1312_v29  ;;  %v1357_v38 = vpack.c.bf16 %v388_v37, %v387_v35  ;;  %v389_v41 = vld [vmem:[%s1986_s4 + $0x1d0] sm:$0xff]  ;;  %v390_v42 = vld [vmem:[%s1986_s4 + $0x1d8] sm:$0xff]  ;;  %v1359_v43 = vpack.c.bf16 %v406_v40, %v405_v39  ;;  %v407_v45 = vld [vmem:[%s1986_s4 + $0x260] sm:$0xff] }
   0xb   :  { %1314 = vmatprep.subr.bf16.mxu1 %v1448_v0  ;;  %v1361_v44 = vpack.c.bf16 %v390_v42, %v389_v41  ;;  %v408_v46 = vld [vmem:[%s1986_s4 + $0x268] sm:$0xff]  ;;  %v391_v47 = vld [vmem:[%s1986_s4 + $0x1e0] sm:$0xff]  ;;  %v409_v51 = vld [vmem:[%s1986_s4 + $0x270] sm:$0xff] }
   0xc   :  { %1295 = vmatpush3.bf16.msra.mxu0 %v1294_v10  ;;  %v392_v48 = vld [vmem:[%s1986_s4 + $0x1e8] sm:$0xff]  ;;  %v1363_v49 = vpack.c.bf16 %v408_v46, %v407_v45  ;;  %v410_v52 = vld [vmem:[%s1986_s4 + $0x278] sm:$0xff]  ;;  %v393_v53 = vld [vmem:[%s1986_s4 + $0x1f0] sm:$0xff]  ;;  %v1451_v45 = vmov -1.0  }
   0xd   :  { %1296 = vmatprep.subr.bf16.mxu0 %v1448_v0  ;;  %v1365_v50 = vpack.c.bf16 %v392_v48, %v391_v47  ;;  %v394_v54 = vld [vmem:[%s1986_s4 + $0x1f8] sm:$0xff]  ;;  %v1367_v55 = vpack.c.bf16 %v410_v52, %v409_v51  ;;  %v411_v57 = vld [vmem:[%s1986_s4 + $0x280] sm:$0xff]  ;;  %v412_v58 = vld [vmem:[%s1986_s4 + $0x288] sm:$0xff] }
   0xe   :  { %1316 = vmatpush3.bf16.msra.mxu1 %v1315_v32  ;;  %v1369_v56 = vpack.c.bf16 %v394_v54, %v393_v53  ;;  %v395_v59 = vld [vmem:[%s1986_s4 + $0x200] sm:$0xff]  ;;  %v396_v60 = vld [vmem:[%s1986_s4 + $0x208] sm:$0xff]  ;;  %v1371_v61 = vpack.c.bf16 %v412_v58, %v411_v57  ;;  %v413_v63 = vld [vmem:[%s1986_s4 + $0x290] sm:$0xff] }
   0xf   :  { %1317 = vmatprep.subr.bf16.mxu1 %v1448_v0  ;;  %v1373_v62 = vpack.c.bf16 %v396_v60, %v395_v59  ;;  %v414_v1 = vld [vmem:[%s1986_s4 + $0x298] sm:$0xff]  ;;  %v397_v2 = vld [vmem:[%s1986_s4 + $0x210] sm:$0xff]  ;;  %v415_v7 = vld [vmem:[%s1986_s4 + $0x2a0] sm:$0xff] }
  0x10   :  { %1298 = vmatpush3.bf16.msra.mxu0 %v1297_v13  ;;  %v398_v3 = vld [vmem:[%s1986_s4 + $0x218] sm:$0xff]  ;;  %v1375_v5 = vpack.c.bf16 %v414_v1, %v413_v63  ;;  %v416_v8 = vld [vmem:[%s1986_s4 + $0x2a8] sm:$0xff]  ;;  %v399_v9 = vld [vmem:[%s1986_s4 + $0x220] sm:$0xff] }
  0x11   :  { %1299 = vmatprep.subr.bf16.mxu0 %v1448_v0  ;;  %v1377_v6 = vpack.c.bf16 %v398_v3, %v397_v2  ;;  %v400_v10 = vld [vmem:[%s1986_s4 + $0x228] sm:$0xff]  ;;  %v1379_v11 = vpack.c.bf16 %v416_v8, %v415_v7  ;;  %v417_v13 = vld [vmem:[%s1986_s4 + $0x2b0] sm:$0xff]  ;;  %v418_v14 = vld [vmem:[%s1986_s4 + $0x2b8] sm:$0xff] }
  0x12   :  { %v1381_v12 = vpack.c.bf16 %v400_v10, %v399_v9  ;;  %v401_v15 = vld [vmem:[%s1986_s4 + $0x230] sm:$0xff]  ;;  %v1383_v17 = vpack.c.bf16 %v418_v14, %v417_v13  ;;  %v1011_v21 = vld [vmem:[%s1989_s6] ss:$0 sm:$0xff]  ;;  %v372_v57 = vld [vmem:[%s1986_s4 + $0x148] sm:$0xff] }
  0x13   :  { %v353_v20 = vld [vmem:[%s1988_s3 + $0x10] sm:$0xff]  ;;  %v228_v48 = vld [vmem:[%s1986_s4 + $0xa0] sm:$0xff]  ;;  %v374_v63 = vld [vmem:[%s1986_s4 + $0x158] sm:$0xff] }
  0x14   :  { %1301 = vmatpush3.bf16.msra.mxu0 %v1300_v16  ;;  %v402_v16 = vld [vmem:[%s1986_s4 + $0x238] sm:$0xff]  ;;  %v230_v54 = vld [vmem:[%s1986_s4 + $0xb0] sm:$0xff]  ;;  %v355_v60 = vld [vmem:[%s1986_s4 + $0xc0] sm:$0xff] }
  0x15   :  { %1302 = vmatprep.subr.bf16.mxu0 %v1448_v0  ;;  %v1385_v18 = vpack.c.bf16 %v402_v16, %v401_v15  ;;  %v227_v1 = vld [vmem:[%s1990_s1] sm:$0xff]  ;;  %v352_v7 = vld [vmem:[%s1988_s3 + $0x8] sm:$0xff]  ;;  %v377_v14 = vld [vmem:[%s1986_s4 + $0x170] sm:$0xff] }
  0x16   :  { %v375_v8 = vld [vmem:[%s1986_s4 + $0x160] sm:$0xff]  ;;  %v376_v9 = vld [vmem:[%s1986_s4 + $0x168] sm:$0xff]  ;;  %v378_v15 = vld [vmem:[%s1986_s4 + $0x178] sm:$0xff] }
  0x17   :  { %v360_v13 = vld [vmem:[%s1986_s4 + $0xe8] sm:$0xff] }
  0x18   :  { %1304 = vmatpush3.bf16.msra.mxu0 %v1303_v19  ;;  %v354_v19 = vld [vmem:[%s1988_s3 + $0x18] sm:$0xff] }
  0x19   :  { %1305 = vmatprep.subr.bf16.mxu0 %v1448_v0 }
  0x1c   :  { %1307 = vmatpush3.bf16.msra.mxu0 %v1306_v22 }
  0x1d   :  { %1308 = vmatprep.subr.bf16.mxu0 %v1448_v0 }
  0x20   :  { %1310 = vmatpush3.bf16.msra.mxu0 %v1309_v25 }
  0x21   :  { %1356 = vmatprep.subr.bf16.mxu0 %v1355_v36 }
  0x23   :  { %1195 = vmatmul.mubr.f32.vlgmr.msra.gmra.mrb[0].mxu0 %v26_v26 }
  0x24   :  { %1358 = vmatpush3.bf16.msra.mxu0 %v1357_v38  ;;  %558 = vmatprep.mubr.f32.mxu0 %v354_v19  ;;  %v362_v19 = vld [vmem:[%s1986_s4 + $0xf8] sm:$0xff] }
  0x25   :  { %1360 = vmatprep.subr.bf16.mxu0 %v1359_v43 }
  0x28   :  { %1362 = vmatpush3.bf16.msra.mxu0 %v1361_v44 }
  0x29   :  { %1364 = vmatprep.subr.bf16.mxu0 %v1363_v49  ;;  %v229_v49 = vld [vmem:[%s1986_s4 + $0xa8] sm:$0xff] }
  0x2a   :  { %v1318_v52 = vpack.c.bf16 %v229_v49, %v228_v48 }
  0x2c   :  { %1366 = vmatpush3.bf16.msra.mxu0 %v1365_v50 }
  0x2d   :  { %1368 = vmatprep.subr.bf16.mxu0 %v1367_v55  ;;  %v231_v55 = vld [vmem:[%s1986_s4 + $0xb8] sm:$0xff] }
  0x2e   :  { %v1321_v58 = vpack.c.bf16 %v231_v55, %v230_v54  ;;  %v590_v54 = vld [vmem:[%s1991_s2] sm:$0xff] }
  0x30   :  { %1370 = vmatpush3.bf16.msra.mxu0 %v1369_v56  ;;  %v371_v56 = vld [vmem:[%s1986_s4 + $0x140] sm:$0xff] }
  0x31   :  { %1372 = vmatprep.subr.bf16.mxu0 %v1371_v61  ;;  %v1323_v59 = vpack.c.bf16 %v372_v57, %v371_v56  ;;  %v356_v61 = vld [vmem:[%s1986_s4 + $0xc8] sm:$0xff]  ;;  %v595_v56 = vsel %vm594_vm3, %v590_v54, 0.0 }
  0x32   :  { %v1325_v2 = vpack.c.bf16 %v356_v61, %v355_v60  ;;  %v1018_v60 = vld [vmem:[%s1989_s6 + $0x5] ss:$0 sm:$0xff] }
  0x34   :  { %1374 = vmatpush3.bf16.msra.mxu0 %v1373_v62  ;;  %v373_v62 = vld [vmem:[%s1986_s4 + $0x150] sm:$0xff] }
  0x35   :  { %1376 = vmatprep.subr.bf16.mxu0 %v1375_v5  ;;  %v1327_v3 = vpack.c.bf16 %v374_v63, %v373_v62  ;;  %v357_v5 = vld [vmem:[%s1986_s4 + $0xd0] sm:$0xff] }
  0x38   :  { %1378 = vmatpush3.bf16.msra.mxu0 %v1377_v6  ;;  %v358_v6 = vld [vmem:[%s1986_s4 + $0xd8] sm:$0xff] }
  0x39   :  { %1380 = vmatprep.subr.bf16.mxu0 %v1379_v11  ;;  %v1329_v10 = vpack.c.bf16 %v358_v6, %v357_v5  ;;  %v1331_v11 = vpack.c.bf16 %v376_v9, %v375_v8 }
  0x3c   :  { %1382 = vmatpush3.bf16.msra.mxu0 %v1381_v12  ;;  %v359_v12 = vld [vmem:[%s1986_s4 + $0xe0] sm:$0xff] }
  0x3d   :  { %1384 = vmatprep.subr.bf16.mxu0 %v1383_v17  ;;  %v1333_v16 = vpack.c.bf16 %v360_v13, %v359_v12  ;;  %v1335_v17 = vpack.c.bf16 %v378_v15, %v377_v14 }
  0x40   :  { %1386 = vmatpush3.bf16.msra.mxu0 %v1385_v18  ;;  %v361_v18 = vld [vmem:[%s1986_s4 + $0xf0] sm:$0xff] }
  0x41   :  { %1405 = vmatprep.subr.bf16.mxu0 %v1448_v0 }
  0x43   :  { %559 = vmatmul.mubr.f32.vlgmr.msra.gmra.mrb[2].mxu0 %v353_v20  ;;  %v379_v20 = vld [vmem:[%s1986_s4 + $0x180] sm:$0xff] }
  0x44   :  { %1254 = vmatprep.mubr.msk.f32.mxu0 %vm1449_vm0, %v1450_v4 }
  0xf6   :  { %v114_v22 = vpop.f32.mrb[0].mxu0 }
  0xf7   :  { %v115_v23 = vadd.f32 %v1011_v21, %v114_v22  ;;  %v1196_v24 = vpop.f32.mrb[1].mxu0  ;;  %v380_v21 = vld [vmem:[%s1986_s4 + $0x188] sm:$0xff]  ;;  %v1337_v22 = vpack.c.bf16 %v362_v19, %v361_v18 }
  0xf8   :  { %v363_v24 = vld [vmem:[%s1986_s4 + $0x100] sm:$0xff] }
  0xf9   :  { %v119_v25 = vmul.f32 0.70710677, %v115_v23  ;;  %v118_v50 = vmul.f32 0.5, %v115_v23  ;;  %v1339_v23 = vpack.c.bf16 %v380_v21, %v379_v20 }
  0xfb   :  { %v122_v26 = vand.u32 2147483647, %v119_v25  ;;  %vm120_vm1 = vcmp.ge.f32.partialorder %v119_v25, 0.0  ;;  %v364_v25 = vld [vmem:[%s1986_s4 + $0x108] sm:$0xff] }
  0xfc   :  { %v121_v46 = vsel %vm120_vm1, 1.0, %v1451_v45 }
  0xfd   :  { %v123_v27 = vmul.f32 0.3275911, %v122_v26  ;;  %v135_v29 = vsub.f32 0.0, %v122_v26 }
  0xff   :  { %v124_v28 = vadd.f32 1.0, %v123_v27  ;;  %v136_v31 = vmul.f32 %v135_v29, %v122_v26  ;;  %v381_v26 = vld [vmem:[%s1986_s4 + $0x190] sm:$0xff]  ;;  %v382_v27 = vld [vmem:[%s1986_s4 + $0x198] sm:$0xff] }
 0x100   :  { %v1343_v29 = vpack.c.bf16 %v382_v27, %v381_v26 }
 0x101   :  { %1436 = vrcp.f32 %v124_v28  ;;  %v137_v34 = vmul.f32 1.442695, %v136_v31  ;;  %v1341_v28 = vpack.c.bf16 %v364_v25, %v363_v24  ;;  %v366_v31 = vld [vmem:[%s1986_s4 + $0x118] sm:$0xff] }
 0x103   :  { %1438 = vpow2.f32 %v137_v34 }
 0x10b   :  { %v1437_v30 = vpop.eup %1436 }
 0x10c   :  { %v126_v32 = vmul.f32 1.0614054, %v1437_v30 }
 0x10d   :  { %v1439_v42 = vpop.eup %1438 }
 0x10e   :  { %v127_v33 = vadd.f32 -1.4531521, %v126_v32  ;;  %v383_v32 = vld [vmem:[%s1986_s4 + $0x1a0] sm:$0xff] }
 0x110   :  { %v128_v35 = vmul.f32 %v1437_v30, %v127_v33  ;;  %v384_v33 = vld [vmem:[%s1986_s4 + $0x1a8] sm:$0xff] }
 0x112   :  { %v129_v36 = vadd.f32 1.4214138, %v128_v35  ;;  %v1347_v35 = vpack.c.bf16 %v384_v33, %v383_v32  ;;  %v644_v32 = vld [vmem:[%s1992_s5 + $0x20] sm:$0xff]  ;;  %v645_v33 = vld [vmem:[%s1992_s5 + $0x28] sm:$0xff] }
 0x114   :  { %v130_v37 = vmul.f32 %v1437_v30, %v129_v36  ;;  %v367_v36 = vld [vmem:[%s1986_s4 + $0x120] sm:$0xff] }
 0x116   :  { %v131_v38 = vadd.f32 -0.28449672, %v130_v37  ;;  %v368_v37 = vld [vmem:[%s1986_s4 + $0x128] sm:$0xff] }
 0x118   :  { %v132_v39 = vmul.f32 %v1437_v30, %v131_v38  ;;  %v385_v38 = vld [vmem:[%s1986_s4 + $0x1b0] sm:$0xff] }
 0x11a   :  { %v133_v40 = vadd.f32 0.2548296, %v132_v39  ;;  %v386_v39 = vld [vmem:[%s1986_s4 + $0x1b8] sm:$0xff] }
 0x11c   :  { %v134_v41 = vmul.f32 %v1437_v30, %v133_v40  ;;  %v365_v30 = vld [vmem:[%s1986_s4 + $0x110] sm:$0xff]  ;;  %v1349_v40 = vpack.c.bf16 %v368_v37, %v367_v36  ;;  %v647_v37 = vld [vmem:[%s1992_s5 + $0x38] sm:$0xff] }
 0x11d   :  { %v1345_v34 = vpack.c.bf16 %v366_v31, %v365_v30  ;;  %v646_v36 = vld [vmem:[%s1992_s5 + $0x30] sm:$0xff] }
 0x11e   :  { %v139_v43 = vmul.f32 %v1439_v42, %v134_v41  ;;  %v1351_v41 = vpack.c.bf16 %v386_v39, %v385_v38  ;;  %v369_v42 = vld [vmem:[%s1986_s4 + $0x130] sm:$0xff]  ;;  %v1391_v39 = vpack.c.bf16 %v647_v37, %v646_v36  ;;  %v1017_v36 = vld [vmem:[%s1989_s6 + $0x4] ss:$0 sm:$0xff] }
 0x120   :  { %v140_v44 = vsub.f32 1.0, %v139_v43  ;;  %v370_v43 = vld [vmem:[%s1986_s4 + $0x138] sm:$0xff] }
 0x122   :  { %v141_v47 = vmul.f32 %v140_v44, %v121_v46  ;;  %v1353_v44 = vpack.c.bf16 %v370_v43, %v369_v42  ;;  %v351_v46 = vld [vmem:[%s1988_s3] sm:$0xff]  ;;  %v649_v42 = vld [vmem:[%s1992_s5 + $0x48] sm:$0xff] }
 0x124   :  { %v142_v51 = vadd.f32 1.0, %v141_v47  ;;  %v1127_v47 = vpop.f32.mrb[2].mxu0 }
 0x125   :  { %v1128_v48 = vpop.f32.mrb[3].mxu0 }
 0x126   :  { %v143_v53 = vmul.f32 %v142_v51, %v118_v50  ;;  %v1129_v49 = vadd.f32 %v1128_v48, %v1127_v47  ;;  %v1012_v50 = vld [vmem:[%s1989_s6 + $0x1] ss:$0 sm:$0xff]  ;;  %v651_v47 = vld [vmem:[%s1992_s5 + $0x58] sm:$0xff] }
 0x128   :  { %1206 = vmatmul.mubr.msk.f32.vlgmr.msra.gmra.mrb[0].mxu1 %vm153_vm2, %v143_v53 }
 0x129   :  { %1319 = vmatpush3.bf16.msra.mxu1 %v1318_v52  ;;  %1216 = vmatprep.mubr.msk.f32.mxu1 %vm1449_vm0, %v1450_v4 }
 0x12a   :  { %1320 = vmatprep.subr.bf16.mxu1 %v1448_v0 }
 0x12d   :  { %1322 = vmatpush3.bf16.msra.mxu1 %v1321_v58 }
 0x12e   :  { %1324 = vmatprep.subr.bf16.mxu1 %v1323_v59 }
 0x130   :  { %1217 = vmatmul.mubr.msk.f32.vlgmr.msra.gmra.mrb[2].mxu1 %vm153_vm2, %v227_v1 }
 0x131   :  { %1326 = vmatpush3.bf16.msra.mxu1 %v1325_v2  ;;  %488 = vmatprep.mubr.f32.mxu1 %v352_v7 }
 0x132   :  { %1328 = vmatprep.subr.bf16.mxu1 %v1327_v3  ;;  %v1014_v3 = vld [vmem:[%s1989_s6 + $0x2] ss:$0 sm:$0xff] }
 0x135   :  { %1330 = vmatpush3.bf16.msra.mxu1 %v1329_v10 }
 0x136   :  { %1332 = vmatprep.subr.bf16.mxu1 %v1331_v11 }
 0x139   :  { %1334 = vmatpush3.bf16.msra.mxu1 %v1333_v16 }
 0x13a   :  { %1336 = vmatprep.subr.bf16.mxu1 %v1335_v17 }
 0x13d   :  { %1338 = vmatpush3.bf16.msra.mxu1 %v1337_v22 }
 0x13e   :  { %1340 = vmatprep.subr.bf16.mxu1 %v1339_v23 }
 0x141   :  { %1342 = vmatpush3.bf16.msra.mxu1 %v1341_v28 }
 0x142   :  { %1344 = vmatprep.subr.bf16.mxu1 %v1343_v29 }
 0x145   :  { %1346 = vmatpush3.bf16.msra.mxu1 %v1345_v34  ;;  %v1388_v34 = vpack.c.bf16 %v645_v33, %v644_v32  ;;  %v805_v32 = vld [vmem:[%s1992_s5 + $0x98] sm:$0xff] }
 0x146   :  { %1348 = vmatprep.subr.bf16.mxu1 %v1347_v35 }
 0x149   :  { %1350 = vmatpush3.bf16.msra.mxu1 %v1349_v40 }
 0x14a   :  { %1352 = vmatprep.subr.bf16.mxu1 %v1351_v41  ;;  %v648_v41 = vld [vmem:[%s1992_s5 + $0x40] sm:$0xff] }
 0x14b   :  { %v1394_v43 = vpack.c.bf16 %v649_v42, %v648_v41  ;;  %v1019_v41 = vld [vmem:[%s1989_s6 + $0x6] ss:$0 sm:$0xff] }
 0x14d   :  { %1354 = vmatpush3.bf16.msra.mxu1 %v1353_v44 }
 0x14e   :  { %1387 = vmatprep.subr.bf16.mxu1 %v1448_v0 }
 0x150   :  { %489 = vmatmul.mubr.f32.vlgmr.msra.gmra.mrb[4].mxu1 %v351_v46  ;;  %v650_v46 = vld [vmem:[%s1992_s5 + $0x50] sm:$0xff] }
 0x151   :  { %1243 = vmatprep.mubr.msk.f32.mxu1 %vm1449_vm0, %v1450_v4  ;;  %1389 = vmatpush3.bf16.msra.mxu1 %v1388_v34 }
 0x152   :  { %1390 = vmatprep.subr.bf16.mxu1 %v1448_v0 }
 0x155   :  { %1392 = vmatpush3.bf16.msra.mxu1 %v1391_v39 }
 0x156   :  { %1393 = vmatprep.subr.bf16.mxu1 %v1448_v0 }
 0x159   :  { %1395 = vmatpush3.bf16.msra.mxu1 %v1394_v43 }
 0x15a   :  { %1396 = vmatprep.subr.bf16.mxu1 %v1448_v0 }
 0x1fb   :  { %v223_v51 = vpop.f32.mrb[0].mxu1 }
 0x1fc   :  { %v224_v52 = vadd.f32 %v1012_v50, %v223_v51  ;;  %v1207_v53 = vpop.f32.mrb[1].mxu1  ;;  %v652_v51 = vld [vmem:[%s1992_s5 + $0x60] sm:$0xff] }
 0x1fd   :  { %v640_v53 = vld [vmem:[%s1992_s5] sm:$0xff] }
 0x1fe   :  { %v591_v55 = vsel %vm153_vm2, %v224_v52, 0.0 }
 0x1ff   :  { %592 = vadd.xlane.f32.xlu0 %v591_v55 }
 0x203   :  { %v306_v57 = vpop.f32.mrb[2].mxu1  ;;  %596 = vadd.xlane.f32.xlu0 %v595_v56 }
 0x204   :  { %v1218_v58 = vpop.f32.mrb[3].mxu1  ;;  %v1823_v5 = vadd.f32 %v1014_v3, %v306_v57 }
 0x205   :  { %v654_v58 = vld [vmem:[%s1992_s5 + $0x70] sm:$0xff] }
 0x206   :  { %v311_v6 = vmul.f32 0.70710677, %v1823_v5 }
 0x208   :  { %v314_v7 = vand.u32 2147483647, %v311_v6  ;;  %vm312_vm4 = vcmp.ge.f32.partialorder %v311_v6, 0.0 }
 0x209   :  { %v313_v48 = vsel %vm312_vm4, 1.0, %v1451_v45  ;;  %v641_v45 = vld [vmem:[%s1992_s5 + $0x8] sm:$0xff] }
 0x20a   :  { %v315_v8 = vmul.f32 0.3275911, %v314_v7  ;;  %v327_v19 = vsub.f32 0.0, %v314_v7  ;;  %v1406_v56 = vpack.c.bf16 %v641_v45, %v640_v53  ;;  %v892_v53 = vld [vmem:[%s1986_s4 + $0x2e8] sm:$0xff]  ;;  %v893_v45 = vld [vmem:[%s1986_s4 + $0x2f0] sm:$0xff] }
 0x20c   :  { %v316_v9 = vadd.f32 1.0, %v315_v8  ;;  %v328_v25 = vmul.f32 %v327_v19, %v314_v7  ;;  %1407 = vmatpush3.bf16.msra.mxu0 %v1406_v56  ;;  %v1016_v8 = vld [vmem:[%s1989_s6 + $0x3] ss:$0 sm:$0xff]  ;;  %v1021_v19 = vld [vmem:[%s1989_s6 + $0x8] ss:$0 sm:$0xff] }
 0x20d   :  { %1408 = vmatprep.subr.bf16.mxu0 %v1448_v0 }
 0x20e   :  { %1440 = vrcp.f32 %v316_v9  ;;  %v329_v29 = vmul.f32 1.442695, %v328_v25  ;;  %v803_v25 = vld [vmem:[%s1992_s5 + $0x88] sm:$0xff] }
 0x210   :  { %1442 = vpow2.f32 %v329_v29 }
 0x218   :  { %v1441_v10 = vpop.eup %1440 }
 0x219   :  { %v318_v11 = vmul.f32 1.0614054, %v1441_v10 }
 0x21a   :  { %v1443_v38 = vpop.eup %1442 }
 0x21b   :  { %v319_v12 = vadd.f32 -1.4531521, %v318_v11 }
 0x21d   :  { %v320_v14 = vmul.f32 %v1441_v10, %v319_v12 }
 0x21f   :  { %v321_v18 = vadd.f32 1.4214138, %v320_v14 }
 0x221   :  { %v322_v24 = vmul.f32 %v1441_v10, %v321_v18  ;;  %v1023_v18 = vld [vmem:[%s1989_s6 + $0xa] ss:$0 sm:$0xff] }
 0x223   :  { %v1092_v59 = vpop.f32.mrb[4].mxu1  ;;  %v323_v28 = vadd.f32 -0.28449672, %v322_v24  ;;  %v802_v24 = vld [vmem:[%s1992_s5 + $0x80] sm:$0xff] }
 0x224   :  { %v1093_v61 = vpop.f32.mrb[5].mxu1  ;;  %v1412_v29 = vpack.c.bf16 %v803_v25, %v802_v24 }
 0x225   :  { %v1094_v62 = vadd.f32 %v1093_v61, %v1092_v59  ;;  %v324_v30 = vmul.f32 %v1441_v10, %v323_v28  ;;  %v655_v59 = vld [vmem:[%s1992_s5 + $0x78] sm:$0xff]  ;;  %v310_v61 = vmul.f32 0.5, %v1823_v5 }
 0x227   :  { %v491_v63 = vadd.f32 %v1094_v62, %v1018_v60  ;;  %v325_v31 = vadd.f32 0.2548296, %v324_v30  ;;  %v642_v60 = vld [vmem:[%s1992_s5 + $0x10] sm:$0xff] }
 0x229   :  { %v1816_v1 = vadd.f32 %v1129_v49, %v491_v63  ;;  %v326_v35 = vmul.f32 %v1441_v10, %v325_v31  ;;  %v1397_v49 = vpack.c.bf16 %v651_v47, %v650_v46  ;;  %v1403_v63 = vpack.c.bf16 %v655_v59, %v654_v58  ;;  %v804_v31 = vld [vmem:[%s1992_s5 + $0x90] sm:$0xff]  ;;  %v887_v46 = vld [vmem:[%s1986_s4 + $0x2c0] sm:$0xff]  ;;  %v888_v47 = vld [vmem:[%s1986_s4 + $0x2c8] sm:$0xff] }
 0x22a   :  { %v1415_v33 = vpack.c.bf16 %v805_v32, %v804_v31 }
 0x22b   :  { %v566_v2 = vsel %vm153_vm2, %v1816_v1, 0.0  ;;  %v331_v40 = vmul.f32 %v1443_v38, %v326_v35  ;;  %1398 = vmatpush3.bf16.msra.mxu1 %v1397_v49  ;;  %v1418_v49 = vpack.c.bf16 %v888_v47, %v887_v46 }
 0x22c   :  { %567 = vadd.xlane.f32.xlu1 %v566_v2  ;;  %1399 = vmatprep.subr.bf16.mxu1 %v1448_v0  ;;  %v643_v2 = vld [vmem:[%s1992_s5 + $0x18] sm:$0xff] }
 0x22d   :  { %v332_v44 = vsub.f32 1.0, %v331_v40  ;;  %v1409_v3 = vpack.c.bf16 %v643_v2, %v642_v60 }
 0x22f   :  { %v333_v50 = vmul.f32 %v332_v44, %v313_v48  ;;  %1410 = vmatpush3.bf16.msra.mxu0 %v1409_v3  ;;  %v889_v48 = vld [vmem:[%s1986_s4 + $0x2d0] sm:$0xff] }
 0x230   :  { %1411 = vmatprep.subr.bf16.mxu0 %v1448_v0 }
 0x231   :  { %v334_v55 = vadd.f32 1.0, %v333_v50  ;;  %v890_v50 = vld [vmem:[%s1986_s4 + $0x2d8] sm:$0xff] }
 0x233   :  { %v335_v7 = vmul.f32 %v334_v55, %v310_v61  ;;  %v894_v55 = vld [vmem:[%s1986_s4 + $0x2f8] sm:$0xff] }
 0x234   :  { %v1427_v56 = vpack.c.bf16 %v894_v55, %v893_v45 }
 0x235   :  { %v341_v10 = vmul.f32 %v1016_v8, %v335_v7  ;;  %v1029_v7 = vld [vmem:[%s1989_s6 + $0xd] ss:$0 sm:$0xff] }
 0x237   :  { %v342_v11 = vsel %vm153_vm2, %v341_v10, 0.0  ;;  %v1031_v10 = vld [vmem:[%s1989_s6 + $0xe] ss:$0 sm:$0xff] }
 0x28c   :  { %v593_v13 = vpop.xlane.xlu0 %592 }
 0x290   :  { %v597_v15 = vpop.xlane.xlu0 %596 }
 0x291   :  { %v598_v16 = vadd.f32 %v597_v15, %v593_v13 }
 0x293   :  { %v599_v17 = vmul.f32 0.0078125, %v598_v16 }
 0x295   :  { %v1826_v20 = vsub.f32 %v224_v52, %v599_v17  ;;  %v1828_v21 = vsub.f32 %v590_v54, %v599_v17  ;;  %v653_v52 = vld [vmem:[%s1992_s5 + $0x68] sm:$0xff] }
 0x296   :  { %v1400_v54 = vpack.c.bf16 %v653_v52, %v652_v51  ;;  %v1421_v51 = vpack.c.bf16 %v890_v50, %v889_v48  ;;  %v891_v52 = vld [vmem:[%s1986_s4 + $0x2e0] sm:$0xff] }
 0x297   :  { %v606_v22 = vmul.f32 %v1828_v21, %v1828_v21  ;;  %v602_v23 = vmul.f32 %v1826_v20, %v1826_v20 }
 0x298   :  { %1401 = vmatpush3.bf16.msra.mxu1 %v1400_v54  ;;  %v1424_v54 = vpack.c.bf16 %v892_v53, %v891_v52 }
 0x299   :  { %v607_v26 = vsel %vm594_vm3, %v606_v22, 0.0  ;;  %v603_v27 = vsel %vm153_vm2, %v602_v23, 0.0  ;;  %1402 = vmatprep.subr.bf16.mxu1 %v1448_v0 }
 0x29a   :  { %608 = vadd.xlane.f32.xlu0 %v607_v26  ;;  %604 = vadd.xlane.f32.xlu1 %v603_v27  ;;  %v1024_v26 = vld [vmem:[%s1989_s6 + $0xb] ss:$0 sm:$0xff]  ;;  %v1022_v27 = vld [vmem:[%s1989_s6 + $0x9] ss:$0 sm:$0xff] }
 0x29c   :  { %1404 = vmatpush3.bf16.msra.mxu1 %v1403_v63 }
 0x29d   :  { %1417 = vmatprep.subr.bf16.mxu1 %v1448_v0 }
 0x2b9   :  { %v568_v57 = vpop.xlane.xlu1 %567 }
 0x2ba   :  { %v570_v62 = vmul.f32 0.03125, %v568_v57 }
 0x2bc   :  { %v571_v6 = vsub.f32 %v1816_v1, %v570_v62  ;;  %v1452_v1 = vmov 0  }
 0x2bd   :  { %1435 = vset.pattern.permute.xlu1 %v1452_v1  ;;  %1434 = vset.pattern.permute.xlu0 %v1452_v1 }
 0x2be   :  { %v572_v5 = vmul.f32 %v571_v6, %v571_v6 }
 0x2c0   :  { %v573_v9 = vsel %vm153_vm2, %v572_v5, 0.0 }
 0x2c1   :  { %574 = vadd.xlane.f32.xlu1 %v573_v9 }
 0x2c5   :  { %343 = vadd.xlane.f32.xlu1 %v342_v11 }
 0x327   :  { %v609_v12 = vpop.xlane.xlu0 %608  ;;  %v605_v13 = vpop.xlane.xlu1 %604 }
 0x328   :  { %v610_v14 = vadd.f32 %v609_v12, %v605_v13  ;;  %v1032_v13 = vld [vmem:[%s1989_s6 + $0xf] ss:$0 sm:$0xff] }
 0x32a   :  { %v611_v15 = vmul.f32 0.0078125, %v610_v14 }
 0x32c   :  { %v612_v16 = vadd.f32 1e-05, %v611_v15 }
 0x32e   :  { %1444 = vrsqrt.f32 %v612_v16  ;;  %v990_v16 = vlaneseq }
 0x338   :  { %v1445_v17 = vpop.eup %1444 }
 0x339   :  { %v614_v22 = vmul.f32 %v1445_v17, %v1826_v20  ;;  %v627_v23 = vmul.f32 %v1445_v17, %v1828_v21  ;;  %v991_v17 = vand.u32 127, %v990_v16 }
 0x33b   :  { %v633_v28 = vmul.f32 %v1023_v18, %v627_v23  ;;  %v620_v20 = vmul.f32 %v1021_v19, %v614_v22  ;;  %vm993_vm6 = vcmp.eq.s32.totalorder %v991_v17, 1  ;;  %vm992_vm7 = vcmp.eq.s32.totalorder %v991_v17, 0 }
 0x33d   :  { %v639_v21 = vadd.f32 %v1024_v26, %v633_v28  ;;  %v626_v30 = vadd.f32 %v1022_v27, %v620_v20 }
 0x33f   :  { %1244 = vmatmul.mubr.msk.f32.vlgmr.msra.gmra.mrb[6].mxu1 %vm594_vm3, %v639_v21  ;;  %1255 = vmatmul.mubr.msk.f32.vlgmr.msra.gmra.mrb[4].mxu0 %vm153_vm2, %v626_v30 }
 0x340   :  { %1413 = vmatpush3.bf16.msra.mxu0 %v1412_v29  ;;  %1265 = vmatprep.mubr.msk.f32.mxu0 %vm1449_vm0, %v1450_v4 }
 0x341   :  { %1414 = vmatprep.subr.bf16.mxu0 %v1448_v0  ;;  %1284 = vmatprep.mubr.msk.f32.mxu1 %vm1449_vm0, %v1450_v4  ;;  %v1020_v4 = vld [vmem:[%s1989_s6 + $0x7] ss:$0 sm:$0xff] }
 0x342   :  { %1419 = vmatpush3.bf16.msra.mxu1 %v1418_v49 }
 0x343   :  { %1420 = vmatprep.subr.bf16.mxu1 %v1448_v0 }
 0x344   :  { %1416 = vmatpush3.bf16.msra.mxu0 %v1415_v33 }
 0x346   :  { %1422 = vmatpush3.bf16.msra.mxu1 %v1421_v51 }
 0x347   :  { %1423 = vmatprep.subr.bf16.mxu1 %v1448_v0 }
 0x34a   :  { %1425 = vmatpush3.bf16.msra.mxu1 %v1424_v54 }
 0x34b   :  { %1426 = vmatprep.subr.bf16.mxu1 %v1448_v0  ;;  %v1028_v0 = vld [vmem:[%s1989_s6 + $0xc] ss:$0 sm:$0xff] }
 0x34e   :  { %v575_v34 = vpop.xlane.xlu1 %574  ;;  %1428 = vmatpush3.bf16.msra.mxu1 %v1427_v56 }
 0x34f   :  { %v576_v35 = vmul.f32 0.03125, %v575_v34 }
 0x351   :  { %v577_v37 = vadd.f32 1e-05, %v576_v35 }
 0x352   :  { %v344_v38 = vpop.xlane.xlu1 %343 }
 0x353   :  { %1446 = vrsqrt.f32 %v577_v37  ;;  %v350_v39 = vadd.f32 %v1017_v36, %v344_v38 }
 0x355   :  { %1002 = vperm.xlu1 %1435, %v350_v39  }
 0x35d   :  { %v1447_v40 = vpop.eup %1446 }
 0x35e   :  { %v579_v42 = vmul.f32 %v1447_v40, %v571_v6 }
 0x360   :  { %v584_v43 = vmul.f32 %v1019_v41, %v579_v42 }
 0x362   :  { %v589_v44 = vadd.f32 %v1020_v4, %v584_v43 }
 0x364   :  { %1266 = vmatmul.mubr.msk.f32.vlgmr.msra.gmra.mrb[6].mxu0 %vm153_vm2, %v589_v44 }
 0x3d4   :  { %v1003_v19 = vpop.permute.xlu1 %1002 }
 0x412   :  { %v725_v57 = vpop.f32.mrb[6].mxu1  ;;  %v798_v58 = vpop.f32.mrb[4].mxu0 }
 0x413   :  { %v799_v59 = vadd.f32 %v798_v58, %v725_v57  ;;  %v1245_v60 = vpop.f32.mrb[7].mxu1  ;;  %v1256_v61 = vpop.f32.mrb[5].mxu0 }
 0x437   :  { %v875_v62 = vpop.f32.mrb[6].mxu0 }
 0x438   :  { %v879_v63 = vadd.f32 %v875_v62, %v799_v59  ;;  %v1267_v2 = vpop.f32.mrb[7].mxu0 }
 0x43a   :  { %v885_v3 = vadd.f32 %v1028_v0, %v879_v63 }
 0x43c   :  { %v886_v6 = vmax.f32 %v885_v3, 0.0 }
 0x43e   :  { %1285 = vmatmul.mubr.msk.f32.vlgmr.msra.gmra.mrb[8].mxu1 %vm900_vm5, %v886_v6 }
 0x511   :  { %v970_v8 = vpop.f32.mrb[8].mxu1 }
 0x512   :  { %v971_v5 = vadd.f32 %v1029_v7, %v970_v8  ;;  %v1286_v9 = vpop.f32.mrb[9].mxu1 }
 0x514   :  { %v974_v11 = vmax.f32 %v971_v5, 0.0 }
 0x516   :  { %v980_v1 = vmul.f32 %v1031_v10, %v974_v11 }
 0x518   :  { %v981_v12 = vsel %vm153_vm2, %v980_v1, 0.0 }
 0x519   :  { %982 = vadd.xlane.f32.xlu0 %v981_v12 }
 0x5a6   :  { %v983_v14 = vpop.xlane.xlu0 %982 }
 0x5a7   :  { %v989_v15 = vadd.f32 %v1032_v13, %v983_v14 }
 0x5a9   :  { %996 = vperm.xlu0 %1434, %v989_v15  }
 0x628   :  { %v997_v18 = vpop.permute.xlu0 %996 }
 0x629   :  { %v999_v22 = vsel %vm993_vm6, %v997_v18, 0.0 }
 0x62a   :  { %v1005_v23 = vsel %vm992_vm7, %v1003_v19, %v999_v22 }
 0x62b   :  { %1006 = vst [vmem:[%s1993_s7] sm:$0xff] %v1005_v23 }

</bundles_post_ra>
